<compile_context>
chip_gen: v5e
topology: v5e:2x2
jax: 0.10.0
libtpu: 0.0.40
codegen_flags: <defaults>
</compile_context>

<pallas_src>
import functools

import jax
import jax.numpy as jnp
from jax.experimental import pallas as pl
from jax.experimental.pallas import tpu as pltpu

_LANES = 128
_SUBLANES = 8
# Only split a would-be single-block grid in two when each half still has >= this many rows
# (keeps per-step overhead negligible while giving dual-TC / megacore something to split).
_MIN_SPLIT_ROWS = 512
_LN2 = 0.6931471805599453


def _round_up(x, m):
    return -(-x // m) * m


def _bce_logits_partial_kernel(pred_ref, tgt_ref, out_ref, *, tile_rows, ncols,
                               num_blocks, valid_rows_last, has_partial_last):
    """One grid step: (8, 128) partial sum of the stable BCE-with-logits loss.

    PyTorch-equivalent elementwise formula:
        loss(x, y) = max(x, 0) - x*y + log1p(exp(-|x|))
    """
    # Native-dtype streaming; the f32 upcast happens on the VPU here.
    x = pred_ref[...].astype(jnp.float32)
    y = tgt_ref[...].astype(jnp.float32)
    elem = jnp.maximum(x, 0.0) - x * y + jnp.log1p(jnp.exp(-jnp.abs(x)))

    def _reduce(e):
        # Vreg-shaped partial: cross-vreg VPU adds only; the single cross-lane reduce
        # and the divide-by-N happen once, outside the kernel.
        return e.reshape(tile_rows // _SUBLANES, _SUBLANES, ncols).sum(axis=0)[None]

    if has_partial_last:
        is_last = pl.program_id(0) == num_blocks - 1

        @pl.when(jnp.logical_not(is_last))
        def _():
            out_ref[...] = _reduce(elem)

        @pl.when(is_last)
        def _():
            # Rows past the end of the (rows_2d, 128) input are whatever the clipped DMA
            # left in VMEM (garbage); a row-index select masks them (NaN/Inf safe).
            row = jax.lax.broadcasted_iota(jnp.int32, (tile_rows, ncols), 0)
            out_ref[...] = _reduce(jnp.where(row < valid_rows_last, elem, 0.0))
    else:
        out_ref[...] = _reduce(elem)


def link_prediction_loss(pred, targets, *, max_tile_rows=2048):
    """Mean binary cross entropy with logits, computed in a Pallas TPU kernel."""
    assert pred.shape == targets.shape
    total = int(pred.size)
    assert total > 0
    ncols = _LANES

    # Lane-dense flatten.  Pad ONLY to the next multiple of 128 elements (needed for the
    # (rows, 128) reshape).  A zero-padded element contributes exactly ln(2) to the sum,
    # which is subtracted once on the host instead of being masked in every grid step.
    flat_pred = pred.reshape(-1)
    flat_tgt = targets.reshape(-1)
    pad128 = (-total) % ncols
    if pad128:
        flat_pred = jnp.pad(flat_pred, (0, pad128))
        flat_tgt = jnp.pad(flat_tgt, (0, pad128))
    rows_2d = (total + pad128) // ncols
    pred2d = flat_pred.reshape(rows_2d, ncols)
    tgt2d = flat_tgt.reshape(rows_2d, ncols)

    # Tile selection: big tiles amortize per-step overhead (kernel is HBM-bound);
    # tile_rows must be a multiple of 8 (sublane constraint on the block shape).
    max_tile_rows = max(_SUBLANES, (int(max_tile_rows) // _SUBLANES) * _SUBLANES)
    tile_rows = min(max_tile_rows, _round_up(rows_2d, _SUBLANES))
    if rows_2d >= 2 * _MIN_SPLIT_ROWS and tile_rows >= rows_2d:
        # Would be a single block: split in two so both cores can take a block.
        tile_rows = _round_up(-(-rows_2d // 2), _SUBLANES)
    num_blocks = -(-rows_2d // tile_rows)
    valid_rows_last = rows_2d - (num_blocks - 1) * tile_rows
    has_partial_last = valid_rows_last != tile_rows

    kernel = functools.partial(
        _bce_logits_partial_kernel,
        tile_rows=tile_rows, ncols=ncols, num_blocks=num_blocks,
        valid_rows_last=valid_rows_last, has_partial_last=has_partial_last,
    )

    in_bytes = rows_2d * ncols * (pred2d.dtype.itemsize + tgt2d.dtype.itemsize)
    out_bytes = num_blocks * _SUBLANES * ncols * 4
    padded_elems = num_blocks * tile_rows * ncols

    partials = pl.pallas_call(
        kernel,
        out_shape=jax.ShapeDtypeStruct((num_blocks, _SUBLANES, ncols), jnp.float32),
        grid_spec=pltpu.PrefetchScalarGridSpec(
            num_scalar_prefetch=0,
            grid=(num_blocks,),
            in_specs=[
                pl.BlockSpec((tile_rows, ncols), lambda i: (i, 0)),
                pl.BlockSpec((tile_rows, ncols), lambda i: (i, 0)),
            ],
            out_specs=pl.BlockSpec((1, _SUBLANES, ncols), lambda i: (i, 0, 0)),
        ),
        compiler_params=pltpu.CompilerParams(
            # Independent per-block partial sums -> megacore / dual-TC shardable.
            dimension_semantics=("parallel",),
        ),
        cost_estimate=pl.CostEstimate(
            flops=6 * padded_elems,
            transcendentals=2 * padded_elems,
            bytes_accessed=in_bytes + out_bytes,
        ),
    )(pred2d, tgt2d)

    # Tiny final reduce + mean in JAX; remove the contribution of the <=127 zero pads.
    loss_sum = jnp.sum(partials)
    if pad128:
        loss_sum = loss_sum - jnp.float32(pad128) * jnp.float32(_LN2)
    return loss_sum / jnp.float32(total)


def _reference_loss(pred, targets):
    x = pred.astype(jnp.float32)
    y = targets.astype(jnp.float32)
    elem = jnp.maximum(x, 0.0) - x * y + jnp.log1p(jnp.exp(-jnp.abs(x)))
    return jnp.mean(elem)


if __name__ == "__main__":
    key = jax.random.PRNGKey(0)
    k1, k2, k3, k4 = jax.random.split(key, 4)

    # Case 1: lane-aligned f32 logits (no pad, single full block).
    pred = jax.random.normal(k1, (128, 128), dtype=jnp.float32) * 2.0
    targets = (jax.random.uniform(k2, (128, 128)) > 0.5).astype(jnp.float32)
    loss = jax.block_until_ready(link_prediction_loss(pred, targets))
    ref = jax.block_until_ready(_reference_loss(pred, targets))
    assert jnp.allclose(loss, ref, rtol=1e-4, atol=1e-6), (loss, ref)

    # Case 2: odd shape -> tiny 128-pad (subtract ln2 trick) + partial-block row mask.
    pred_odd = jax.random.normal(k3, (3, 5, 41), dtype=jnp.float32) * 2.0
    targets_odd = (jax.random.uniform(k4, (3, 5, 41)) > 0.5).astype(jnp.float32)
    loss_odd = jax.block_until_ready(link_prediction_loss(pred_odd, targets_odd))
    ref_odd = jax.block_until_ready(_reference_loss(pred_odd, targets_odd))
    assert jnp.allclose(loss_odd, ref_odd, rtol=1e-4, atol=1e-6), (loss_odd, ref_odd)

    # Case 3: bf16 inputs stream at native width (f32 cast happens on the VPU in-kernel).
    pred_bf = pred.astype(jnp.bfloat16)
    targets_bf = targets.astype(jnp.bfloat16)
    loss_bf = jax.block_until_ready(link_prediction_loss(pred_bf, targets_bf))
    ref_bf = jax.block_until_ready(_reference_loss(pred_bf, targets_bf))
    assert jnp.allclose(loss_bf, ref_bf, rtol=1e-4, atol=1e-5), (loss_bf, ref_bf)

    # Case 4: force a multi-block grid with a partial last block (pl.when-gated mask path).
    loss_mb = jax.block_until_ready(link_prediction_loss(pred, targets, max_tile_rows=48))
    assert jnp.allclose(loss_mb, ref, rtol=1e-4, atol=1e-6), (loss_mb, ref)

    print("KERNEL_OK")
</pallas_src>

<mosaic_0001>
module attributes {stable_mosaic.version = 11 : i64} {
  func.func @_bce_logits_partial_kernel(%arg0: i32, %arg1: memref<128x128xf32, #tpu.memory_space<vmem>>, %arg2: memref<128x128xf32, #tpu.memory_space<vmem>>, %arg3: memref<1x8x128xf32, #tpu.memory_space<vmem>>) attributes {dimension_semantics = [#tpu.dimension_semantics<parallel>], iteration_bounds = array<i64: 1>, scalar_prefetch = 0 : i64, scratch_operands = 0 : i64, tpu.core_type = #tpu.core_type<tc>, window_params = [{transform_indices = @transform_0, window_bounds = array<i64: 128, 128>}, {transform_indices = @transform_1, window_bounds = array<i64: 128, 128>}, {transform_indices = @transform_2, window_bounds = array<i64: 1, 8, 128>}]} {
    %c0 = arith.constant 0 : index
    %c0_0 = arith.constant 0 : index
    %0 = vector.load %arg1[%c0, %c0_0] : memref<128x128xf32, #tpu.memory_space<vmem>>, vector<128x128xf32>
    %c0_1 = arith.constant 0 : index
    %c0_2 = arith.constant 0 : index
    %1 = vector.load %arg2[%c0_1, %c0_2] : memref<128x128xf32, #tpu.memory_space<vmem>>, vector<128x128xf32>
    %cst = arith.constant 0.000000e+00 : f32
    %2 = vector.broadcast %cst : f32 to vector<128x128xf32>
    %3 = arith.maximumf %0, %2 : vector<128x128xf32>
    %4 = arith.mulf %0, %1 : vector<128x128xf32>
    %5 = arith.subf %3, %4 : vector<128x128xf32>
    %6 = math.absf %0 : vector<128x128xf32>
    %cst_3 = arith.constant 0.000000e+00 : f32
    %7 = vector.broadcast %cst_3 : f32 to vector<128x128xf32>
    %8 = arith.subf %7, %6 : vector<128x128xf32>
    %9 = math.exp %8 : vector<128x128xf32>
    %10 = math.log1p %9 : vector<128x128xf32>
    %11 = arith.addf %5, %10 : vector<128x128xf32>
    %12 = vector.shape_cast %11 : vector<128x128xf32> to vector<16x8x128xf32>
    %cst_4 = arith.constant dense<0.000000e+00> : vector<8x128xf32>
    %13 = vector.multi_reduction <add>, %12, %cst_4 [0] : vector<16x8x128xf32> to vector<8x128xf32>
    %14 = vector.shape_cast %13 : vector<8x128xf32> to vector<1x8x128xf32>
    %c0_5 = arith.constant 0 : index
    %c0_6 = arith.constant 0 : index
    %c0_7 = arith.constant 0 : index
    %15 = vector.load %arg3[%c0_5, %c0_6, %c0_7] : memref<1x8x128xf32, #tpu.memory_space<vmem>>, vector<1x8x128xf32>
    tpu.vector_store %arg3[%c0_5, %c0_6, %c0_7], %14 {strides = array<i32>} : memref<1x8x128xf32, #tpu.memory_space<vmem>>, vector<1x8x128xf32>,
    return
  }
  func.func @transform_0(%arg0: i32) -> (i32, i32) {
    %c0_i32 = arith.constant 0 : i32
    %c0_i32_0 = arith.constant 0 : i32
    return %arg0, %c0_i32 : i32, i32
  }
  func.func @transform_1(%arg0: i32) -> (i32, i32) {
    %c0_i32 = arith.constant 0 : i32
    %c0_i32_0 = arith.constant 0 : i32
    return %arg0, %c0_i32 : i32, i32
  }
  func.func @transform_2(%arg0: i32) -> (i32, i32, i32) {
    %c0_i32 = arith.constant 0 : i32
    %c0_i32_0 = arith.constant 0 : i32
    %c0_i32_1 = arith.constant 0 : i32
    return %arg0, %c0_i32, %c0_i32_0 : i32, i32, i32
  }
}

</mosaic_0001>

<bundles_post_ra>
// kernel: tpu_custom_call.1
= control target key start
LH: loop header
LB: loop body
LE: loop exit
PB: predicated region body
PF: predicated region fallthrough
CT: control target
= control target key end

     0   :  { %7 = vsyncpa [#allocation3], 0  ;;  %s928_s0 = inlined_call_operand.hbm [shape: f32[128,128], index: 0, kind: input, shape index: {}]   ;;  %s929_s1 = inlined_call_operand.hbm [shape: f32[128,128], index: 1, kind: input, shape index: {}]   ;;  %s930_s2 = inlined_call_operand.hbm [shape: f32[1,8,128], index: 2, kind: output, shape index: {}]  }
   0x1   :  { %8 = vsyncpa [#allocation6], 0 }
   0x2   :  { %9 = vsyncpa [#allocation4], 0  ;;  %s14_s11 = sshll.u32 %s928_s0, 4  ;;  %s529_s12 = smov [#allocation2]   ;;  %s15_s11 = int_to_ptr.hbm [resolvable:$true] %s14_s11 }
   0x3   :  { %s16_s13 = sshll.u32 %s529_s12, 4  ;;  %s27_s16 = sshll.u32 %s929_s1, 4  ;;  %s17_s13 = int_to_ptr.vmem [resolvable:$true] %s16_s13  ;;  %s28_s16 = int_to_ptr.hbm [resolvable:$true] %s27_s16 }
   0x4   :  { %s530_s17 = smov 128   ;;  %s531_s18 = smov 8  }
   0x5   :  { %22 = dma.hbm_to_vmem [thread:$0]  %s15_s11, 2048, %s17_s13, [#allocation3], %s530_s17, %s530_s17, %s531_s18  }
   0x6   :  { %s532_s19 = smov [#allocation5]  }
   0x7   :  { %s29_s20 = sshll.u32 %s532_s19, 4  ;;  %s30_s20 = int_to_ptr.vmem [resolvable:$true] %s29_s20 }
   0x8   :  { %35 = dma.hbm_to_vmem [thread:$0]  %s28_s16, 2048, %s30_s20, [#allocation6], %s530_s17, %s530_s17, %s531_s18  }
   0x9   :  { %523 = dma.done.wait [#allocation3], 2048  }
   0xa   :  { %524 = vsyncadd [#allocation3], 4294965248 }
   0xb   :  { %525 = dma.done.wait [#allocation6], 2048  }
   0xc   :  { %526 = vsyncadd [#allocation6], 4294965248  ;;  %v44_v0 = vld [vmem:[#allocation2] sm:$0xff]  ;;  %v555_v1 = vld [vmem:[#allocation2 + $0x8] sm:$0xff]  ;;  %s533_s0 = smov [#allocation7]   ;;  %s371_s23 = sshll.u32 %s930_s2, 4  ;;  %s372_s23 = int_to_ptr.hbm [resolvable:$true] %s371_s23 }
   0xd   :  { %v557_v2 = vld [vmem:[#allocation2 + $0x10] sm:$0xff]  ;;  %v559_v3 = vld [vmem:[#allocation2 + $0x18] sm:$0xff]  ;;  %v561_v4 = vld [vmem:[#allocation2 + $0x20] sm:$0xff]  ;;  %v76_v7 = vmax.f32 %v44_v0, 0.0  ;;  %v77_v11 = vmax.f32 %v555_v1, 0.0  ;;  %s369_s1 = sshll.u32 %s533_s0, 4  ;;  %s370_s1 = int_to_ptr.vmem [resolvable:$true] %s369_s1 }
   0xe   :  { %v563_v5 = vld [vmem:[#allocation2 + $0x28] sm:$0xff]  ;;  %v565_v6 = vld [vmem:[#allocation2 + $0x30] sm:$0xff]  ;;  %v567_v8 = vld [vmem:[#allocation2 + $0x38] sm:$0xff]  ;;  %v78_v12 = vmax.f32 %v557_v2, 0.0  ;;  %v79_v13 = vmax.f32 %v559_v3, 0.0  ;;  %v80_v17 = vmax.f32 %v561_v4, 0.0 }
   0xf   :  { %v569_v9 = vld [vmem:[#allocation2 + $0x40] sm:$0xff]  ;;  %v571_v10 = vld [vmem:[#allocation2 + $0x48] sm:$0xff]  ;;  %v576_v14 = vld [vmem:[#allocation2 + $0x50] sm:$0xff]  ;;  %v81_v18 = vmax.f32 %v563_v5, 0.0  ;;  %v82_v19 = vmax.f32 %v565_v6, 0.0  ;;  %v83_v23 = vmax.f32 %v567_v8, 0.0 }
  0x10   :  { %v578_v15 = vld [vmem:[#allocation2 + $0x58] sm:$0xff]  ;;  %v580_v16 = vld [vmem:[#allocation2 + $0x60] sm:$0xff]  ;;  %v585_v20 = vld [vmem:[#allocation2 + $0x68] sm:$0xff]  ;;  %v84_v24 = vmax.f32 %v569_v9, 0.0  ;;  %v85_v25 = vmax.f32 %v571_v10, 0.0  ;;  %v86_v28 = vmax.f32 %v576_v14, 0.0 }
  0x11   :  { %v587_v21 = vld [vmem:[#allocation2 + $0x70] sm:$0xff]  ;;  %v60_v22 = vld [vmem:[#allocation5] sm:$0xff]  ;;  %v61_v26 = vld [vmem:[#allocation5 + $0x8] sm:$0xff]  ;;  %v87_v29 = vmax.f32 %v578_v15, 0.0  ;;  %v124_v30 = vand.u32 2147483647, %v44_v0 }
  0x12   :  { %v62_v27 = vld [vmem:[#allocation5 + $0x10] sm:$0xff]  ;;  %v594_v31 = vld [vmem:[#allocation2 + $0x78] sm:$0xff]  ;;  %v64_v33 = vld [vmem:[#allocation5 + $0x20] sm:$0xff]  ;;  %v88_v34 = vmax.f32 %v580_v16, 0.0  ;;  %v125_v35 = vand.u32 2147483647, %v555_v1  ;;  %v92_v40 = vmul.f32 %v60_v22, %v44_v0  ;;  %v93_v44 = vmul.f32 %v61_v26, %v555_v1 }
  0x13   :  { %v63_v32 = vld [vmem:[#allocation5 + $0x18] sm:$0xff]  ;;  %v65_v36 = vld [vmem:[#allocation5 + $0x28] sm:$0xff]  ;;  %v66_v37 = vld [vmem:[#allocation5 + $0x30] sm:$0xff]  ;;  %v126_v41 = vand.u32 2147483647, %v557_v2  ;;  %v94_v45 = vmul.f32 %v62_v27, %v557_v2  ;;  %v609_v50 = vmul.f32 %v64_v33, %v561_v4  ;;  %v140_v52 = vsub.f32 0.0, %v124_v30 }
  0x14   :  { %v67_v42 = vld [vmem:[#allocation5 + $0x38] sm:$0xff]  ;;  %v127_v46 = vand.u32 2147483647, %v559_v3  ;;  %v68_v47 = vld [vmem:[#allocation5 + $0x40] sm:$0xff]  ;;  %v69_v48 = vld [vmem:[#allocation5 + $0x48] sm:$0xff]  ;;  %v606_v49 = vmul.f32 %v63_v32, %v559_v3  ;;  %v613_v54 = vmul.f32 %v65_v36, %v563_v5  ;;  %v616_v55 = vmul.f32 %v66_v37, %v565_v6 }
  0x15   :  { %v128_v51 = vand.u32 2147483647, %v561_v4  ;;  %v70_v53 = vld [vmem:[#allocation5 + $0x50] sm:$0xff]  ;;  %v129_v56 = vand.u32 2147483647, %v563_v5  ;;  %v141_v57 = vsub.f32 0.0, %v125_v35  ;;  %v620_v58 = vmul.f32 %v67_v42, %v567_v8 }
  0x16   :  { %v622_v59 = vsub.f32 %v76_v7, %v92_v40  ;;  %v130_v60 = vand.u32 2147483647, %v565_v6  ;;  %v142_v61 = vsub.f32 0.0, %v126_v41  ;;  %v71_v62 = vld [vmem:[#allocation5 + $0x58] sm:$0xff]  ;;  %v626_v63 = vmul.f32 %v68_v47, %v569_v9  ;;  %v72_v26 = vld [vmem:[#allocation5 + $0x60] sm:$0xff]  ;;  %v74_v39 = vld [vmem:[#allocation5 + $0x70] sm:$0xff] }
  0x17   :  { %v629_v0 = vmul.f32 %v69_v48, %v571_v10  ;;  %v131_v1 = vand.u32 2147483647, %v567_v8  ;;  %v143_v22 = vsub.f32 0.0, %v127_v46  ;;  %v633_v27 = vmul.f32 %v70_v53, %v576_v14 }
  0x18   :  { %v132_v7 = vand.u32 2147483647, %v569_v9  ;;  %v144_v30 = vsub.f32 0.0, %v128_v51  ;;  %v156_v32 = vmul.f32 1.442695, %v140_v52  ;;  %v636_v33 = vsub.f32 %v77_v11, %v93_v44  ;;  %v73_v11 = vld [vmem:[#allocation5 + $0x68] sm:$0xff] }
  0x19   :  { %v133_v35 = vand.u32 2147483647, %v571_v10  ;;  %v145_v36 = vsub.f32 0.0, %v129_v56  ;;  %v158_v37 = vmul.f32 1.442695, %v141_v57  ;;  %v640_v40 = vmul.f32 %v71_v62, %v578_v15 }
  0x1a   :  { %v134_v41 = vand.u32 2147483647, %v576_v14  ;;  %v146_v42 = vsub.f32 0.0, %v130_v60  ;;  %v160_v46 = vmul.f32 1.442695, %v142_v61  ;;  %v644_v47 = vmul.f32 %v72_v26, %v580_v16 }
  0x1b   :  { %v135_v48 = vand.u32 2147483647, %v578_v15  ;;  %v147_v51 = vsub.f32 0.0, %v131_v1  ;;  %v162_v52 = vmul.f32 1.442695, %v143_v22  ;;  %v148_v53 = vsub.f32 0.0, %v132_v7 }
  0x1c   :  { %v136_v44 = vand.u32 2147483647, %v580_v16  ;;  %387 = vpow2.f32 %v156_v32  ;;  %v164_v56 = vmul.f32 1.442695, %v144_v30  ;;  %v137_v57 = vand.u32 2147483647, %v585_v20 }
  0x1d   :  { %v149_v62 = vsub.f32 0.0, %v133_v35  ;;  %389 = vpow2.f32 %v158_v37  ;;  %v166_v43 = vmul.f32 1.442695, %v145_v36  ;;  %v138_v60 = vand.u32 2147483647, %v587_v21 }
  0x1e   :  { %v150_v61 = vsub.f32 0.0, %v134_v41  ;;  %391 = vpow2.f32 %v160_v46  ;;  %v168_v26 = vmul.f32 1.442695, %v146_v42  ;;  %v651_v1 = vmul.f32 %v73_v11, %v585_v20 }
  0x1f   :  { %v151_v22 = vsub.f32 0.0, %v135_v48  ;;  %393 = vpow2.f32 %v162_v52  ;;  %v170_v38 = vmul.f32 1.442695, %v147_v51  ;;  %v655_v7 = vsub.f32 %v78_v12, %v94_v45 }
  0x20   :  { %v152_v30 = vsub.f32 0.0, %v136_v44  ;;  %395 = vpow2.f32 %v164_v56  ;;  %v172_v32 = vmul.f32 1.442695, %v148_v53  ;;  %v139_v35 = vand.u32 2147483647, %v594_v31 }
  0x21   :  { %v153_v36 = vsub.f32 0.0, %v137_v57  ;;  %397 = vpow2.f32 %v166_v43  ;;  %v174_v37 = vmul.f32 1.442695, %v149_v62  ;;  %v659_v42 = vmul.f32 %v74_v39, %v587_v21 }
  0x22   :  { %v388_v41 = vpop.eup %387  ;;  %v154_v46 = vsub.f32 0.0, %v138_v60  ;;  %399 = vpow2.f32 %v168_v26  ;;  %v176_v48 = vmul.f32 1.442695, %v150_v61  ;;  %v666_v2 = vsub.f32 %v79_v13, %v606_v49 }
  0x23   :  { %v661_v51 = vpop.eup %389  ;;  %v671_v12 = vsub.f32 %v80_v17, %v609_v50  ;;  %401 = vpow2.f32 %v170_v38  ;;  %v178_v43 = vmul.f32 1.442695, %v151_v22  ;;  %v678_v39 = vsub.f32 %v81_v18, %v613_v54 }
  0x24   :  { %v673_v45 = vpop.eup %391  ;;  %v683_v3 = vsub.f32 %v82_v19, %v616_v55  ;;  %403 = vpow2.f32 %v172_v32  ;;  %v180_v13 = vmul.f32 1.442695, %v152_v30  ;;  %v690_v4 = vsub.f32 %v83_v23, %v620_v58 }
  0x25   :  { %v685_v49 = vpop.eup %393  ;;  %v155_v17 = vsub.f32 0.0, %v139_v35  ;;  %405 = vpow2.f32 %v174_v37  ;;  %v182_v38 = vmul.f32 1.442695, %v153_v36  ;;  %v697_v6 = vsub.f32 %v84_v24, %v626_v63 }
  0x26   :  { %v692_v5 = vpop.eup %395  ;;  %407 = vpow2.f32 %v176_v48  ;;  %v184_v18 = vmul.f32 1.442695, %v154_v46  ;;  %v191_v19 = vmul.f32 -0.5, %v388_v41  ;;  %v704_v8 = vsub.f32 %v85_v25, %v629_v0 }
  0x27   :  { %v699_v50 = vpop.eup %397  ;;  %v709_v23 = vsub.f32 %v86_v28, %v633_v27  ;;  %409 = vpow2.f32 %v178_v43  ;;  %v188_v54 = vadd.f32 1.0, %v388_v41  ;;  %v716_v24 = vsub.f32 %v87_v29, %v640_v40 }
  0x28   :  { %v711_v9 = vpop.eup %399  ;;  %411 = vpow2.f32 %v180_v13  ;;  %v197_v55 = vadd.f32 1.0, %v661_v51  ;;  %v200_v10 = vmul.f32 -0.5, %v661_v51  ;;  %v186_v14 = vmul.f32 1.442695, %v155_v17 }
  0x29   :  { %v720_v25 = vpop.eup %401  ;;  %413 = vpow2.f32 %v182_v38  ;;  %v194_v28 = vand.u32 2147483647, %v388_v41  ;;  %v209_v58 = vmul.f32 -0.5, %v673_v45  ;;  %v192_v0 = vadd.f32 1.0, %v191_v19 }
  0x2a   :  { %v723_v63 = vpop.eup %403  ;;  %415 = vpow2.f32 %v184_v18  ;;  %v203_v15 = vand.u32 2147483647, %v661_v51  ;;  %v206_v29 = vadd.f32 1.0, %v673_v45  ;;  %v732_v40 = vsub.f32 %v88_v34, %v644_v47 }
  0x2b   :  { %v727_v27 = vpop.eup %405  ;;  %417 = vlog2.f32 %v188_v54  ;;  %v215_v52 = vadd.f32 1.0, %v685_v49  ;;  %v218_v11 = vmul.f32 -0.5, %v685_v49  ;;  %v201_v53 = vadd.f32 1.0, %v200_v10 }
  0x2c   :  { %v736_v44 = vpop.eup %407  ;;  %419 = vlog2.f32 %v197_v55  ;;  %v212_v56 = vand.u32 2147483647, %v673_v45  ;;  %v224_v57 = vadd.f32 1.0, %v692_v5  ;;  %v210_v60 = vadd.f32 1.0, %v209_v58 }
  0x2d   :  { %v740_v62 = vpop.eup %409  ;;  %421 = vpow2.f32 %v186_v14  ;;  %v227_v16 = vmul.f32 -0.5, %v692_v5  ;;  %v233_v34 = vadd.f32 1.0, %v699_v50  ;;  %v746_v61 = vmul.f32 %v388_v41, %v192_v0 }
  0x2e   :  { %v744_v47 = vpop.eup %411  ;;  %vm748_vm0 = vcmp.lt.f32.partialorder %v194_v28, 0.0004427343  ;;  %vm752_vm1 = vcmp.lt.f32.partialorder %v203_v15, 0.0004427343  ;;  %423 = vlog2.f32 %v206_v29  ;;  %v236_v30 = vmul.f32 -0.5, %v699_v50 }
  0x2f   :  { %v242_v32 = vadd.f32 1.0, %v711_v9  ;;  %v758_v35 = vpop.eup %413  ;;  %425 = vlog2.f32 %v215_v52  ;;  %v219_v36 = vadd.f32 1.0, %v218_v11  ;;  %v221_v37 = vand.u32 2147483647, %v685_v49 }
  0x30   :  { %v245_v41 = vmul.f32 -0.5, %v711_v9  ;;  %v762_v46 = vpop.eup %415  ;;  %v202_v48 = vmul.f32 %v661_v51, %v201_v53  ;;  %vm765_vm2 = vcmp.lt.f32.partialorder %v212_v56, 0.0004427343  ;;  %427 = vlog2.f32 %v224_v57 }
  0x31   :  { %v230_v13 = vand.u32 2147483647, %v692_v5  ;;  %v418_v17 = vpop.eup %417  ;;  %v771_v38 = vmul.f32 %v673_v45, %v210_v60  ;;  %v228_v18 = vadd.f32 1.0, %v227_v16  ;;  %429 = vlog2.f32 %v233_v34 }
  0x32   :  { %v239_v19 = vand.u32 2147483647, %v699_v50  ;;  %v420_v54 = vpop.eup %419  ;;  %v237_v55 = vadd.f32 1.0, %v236_v30  ;;  %431 = vlog2.f32 %v242_v32  ;;  %v251_v51 = vadd.f32 1.0, %v720_v25 }
  0x33   :  { %v254_v10 = vmul.f32 -0.5, %v720_v25  ;;  %v776_v14 = vpop.eup %421  ;;  %v779_v28 = vmul.f32 %v685_v49, %v219_v36  ;;  %vm781_vm3 = vcmp.lt.f32.partialorder %v221_v37, 0.0004427343  ;;  %v246_v45 = vadd.f32 1.0, %v245_v41 }
  0x34   :  { %v248_v0 = vand.u32 2147483647, %v711_v9  ;;  %v424_v15 = vpop.eup %423  ;;  %vm786_vm4 = vcmp.lt.f32.partialorder %v230_v13, 0.0004427343  ;;  %v257_v52 = vand.u32 2147483647, %v720_v25  ;;  %v229_v60 = vmul.f32 %v692_v5, %v228_v18 }
  0x35   :  { %v260_v11 = vadd.f32 1.0, %v723_v63  ;;  %v263_v53 = vmul.f32 -0.5, %v723_v63  ;;  %v426_v49 = vpop.eup %425  ;;  %v190_v56 = vmul.f32 0.6931472, %v418_v17  ;;  %v199_v57 = vmul.f32 0.6931472, %v420_v54 }
  0x36   :  { %vm794_vm5 = vcmp.lt.f32.partialorder %v239_v19, 0.0004427343  ;;  %v428_v34 = vpop.eup %427  ;;  %v799_v30 = vmul.f32 %v699_v50, %v237_v55  ;;  %433 = vlog2.f32 %v251_v51  ;;  %v255_v32 = vadd.f32 1.0, %v254_v10 }
  0x37   :  { %v269_v36 = vadd.f32 1.0, %v727_v27  ;;  %v430_v37 = vpop.eup %429  ;;  %v208_v41 = vmul.f32 0.6931472, %v424_v15  ;;  %v803_v13 = vmul.f32 %v711_v9, %v246_v45  ;;  %vm805_vm6 = vcmp.lt.f32.partialorder %v248_v0, 0.0004427343 }
  0x38   :  { %v272_v5 = vmul.f32 -0.5, %v727_v27  ;;  %v432_v18 = vpop.eup %431  ;;  %vm810_vm7 = vcmp.lt.f32.partialorder %v257_v52, 0.0004427343  ;;  %435 = vlog2.f32 %v260_v11  ;;  %v264_v50 = vadd.f32 1.0, %v263_v53 }
  0x39   :  { %v266_v54 = vand.u32 2147483647, %v723_v63  ;;  %v196_v9 = vsel %vm748_vm0, %v746_v61, %v190_v56  ;;  %v205_v55 = vsel %vm752_vm1, %v202_v48, %v199_v57  ;;  %v217_v51 = vmul.f32 0.6931472, %v426_v49 }
  0x3a   :  { %v226_v10 = vmul.f32 0.6931472, %v428_v34  ;;  %v821_v45 = vmul.f32 %v720_v25, %v255_v32  ;;  %437 = vlog2.f32 %v269_v36  ;;  %v275_v0 = vand.u32 2147483647, %v727_v27 }
  0x3b   :  { %v278_v15 = vadd.f32 1.0, %v736_v44  ;;  %v214_v52 = vsel %vm765_vm2, %v771_v38, %v208_v41  ;;  %v235_v11 = vmul.f32 0.6931472, %v430_v37  ;;  %v244_v26 = vmul.f32 0.6931472, %v432_v18 }
  0x3c   :  { %v273_v61 = vadd.f32 1.0, %v272_v5  ;;  %v434_v53 = vpop.eup %433  ;;  %vm828_vm8 = vcmp.lt.f32.partialorder %v266_v54, 0.0004427343  ;;  %v287_v25 = vadd.f32 1.0, %v740_v62  ;;  %v332_v48 = vadd.f32 %v196_v9, %v622_v59 }
  0x3d   :  { %v333_v49 = vadd.f32 %v205_v55, %v636_v33  ;;  %v223_v56 = vsel %vm781_vm3, %v779_v28, %v217_v51  ;;  %v232_v43 = vsel %vm786_vm4, %v229_v60, %v226_v10  ;;  %v265_v38 = vmul.f32 %v723_v63, %v264_v50 }
  0x3e   :  { %v281_v57 = vmul.f32 -0.5, %v736_v44  ;;  %v436_v34 = vpop.eup %435  ;;  %vm842_vm9 = vcmp.lt.f32.partialorder %v275_v0, 0.0004427343  ;;  %439 = vlog2.f32 %v278_v15  ;;  %v296_v59 = vadd.f32 1.0, %v744_v47 }
  0x3f   :  { %v334_v33 = vadd.f32 %v214_v52, %v655_v7  ;;  %v241_v28 = vsel %vm794_vm5, %v799_v30, %v235_v11  ;;  %v250_v63 = vsel %vm805_vm6, %v803_v13, %v244_v26  ;;  %v253_v58 = vmul.f32 0.6931472, %v434_v53 }
  0x40   :  { %v274_v29 = vmul.f32 %v727_v27, %v273_v61  ;;  %v438_v60 = vpop.eup %437  ;;  %441 = vlog2.f32 %v287_v25  ;;  %v305_v36 = vadd.f32 1.0, %v758_v35  ;;  %v335_v37 = vadd.f32 %v223_v56, %v666_v2 }
  0x41   :  { %v348_v41 = vadd.f32 %v333_v49, %v332_v48  ;;  %v262_v5 = vmul.f32 0.6931472, %v436_v34  ;;  %v282_v7 = vadd.f32 1.0, %v281_v57  ;;  %v284_v18 = vand.u32 2147483647, %v736_v44 }
  0x42   :  { %v290_v16 = vmul.f32 -0.5, %v740_v62  ;;  %443 = vlog2.f32 %v296_v59  ;;  %v314_v30 = vadd.f32 1.0, %v762_v46  ;;  %v336_v13 = vadd.f32 %v232_v43, %v671_v12 }
  0x43   :  { %v349_v17 = vadd.f32 %v348_v41, %v334_v33  ;;  %v259_v27 = vsel %vm810_vm7, %v821_v45, %v253_v58  ;;  %v271_v50 = vmul.f32 0.6931472, %v438_v60  ;;  %v293_v2 = vand.u32 2147483647, %v740_v62 }
  0x44   :  { %v299_v54 = vmul.f32 -0.5, %v744_v47  ;;  %v440_v9 = vpop.eup %439  ;;  %445 = vlog2.f32 %v305_v36  ;;  %v323_v55 = vadd.f32 1.0, %v776_v14  ;;  %v337_v51 = vadd.f32 %v241_v28, %v678_v39 }
  0x45   :  { %v350_v10 = vadd.f32 %v349_v17, %v335_v37  ;;  %v268_v12 = vsel %vm828_vm8, %v265_v38, %v262_v5  ;;  %v283_v0 = vmul.f32 %v736_v44, %v282_v7  ;;  %v291_v15 = vadd.f32 1.0, %v290_v16 }
  0x46   :  { %v308_v19 = vmul.f32 -0.5, %v758_v35  ;;  %v442_v45 = vpop.eup %441  ;;  %vm872_vm10 = vcmp.lt.f32.partialorder %v284_v18, 0.0004427343  ;;  %447 = vlog2.f32 %v314_v30  ;;  %v338_v11 = vadd.f32 %v250_v63, %v683_v3 }
  0x47   :  { %v351_v26 = vadd.f32 %v350_v10, %v336_v13  ;;  %v280_v61 = vmul.f32 0.6931472, %v440_v9  ;;  %v300_v39 = vadd.f32 1.0, %v299_v54  ;;  %v302_v53 = vand.u32 2147483647, %v744_v47 }
  0x48   :  { %v317_v22 = vmul.f32 -0.5, %v762_v46  ;;  %v444_v25 = vpop.eup %443  ;;  %v277_v44 = vsel %vm842_vm9, %v274_v29, %v271_v50  ;;  %449 = vlog2.f32 %v323_v55  ;;  %v339_v48 = vadd.f32 %v259_v27, %v690_v4  ;;  %v75_v29 = vld [vmem:[#allocation5 + $0x78] sm:$0xff] }
  0x49   :  { %v352_v49 = vadd.f32 %v351_v26, %v337_v51  ;;  %v289_v56 = vmul.f32 0.6931472, %v442_v45  ;;  %v292_v43 = vmul.f32 %v740_v62, %v291_v15  ;;  %v309_v38 = vadd.f32 1.0, %v308_v19 }
  0x4a   :  { %v326_v3 = vmul.f32 -0.5, %v776_v14  ;;  %v446_v57 = vpop.eup %445  ;;  %vm884_vm11 = vcmp.lt.f32.partialorder %v293_v2, 0.0004427343  ;;  %v311_v59 = vand.u32 2147483647, %v758_v35  ;;  %v340_v32 = vadd.f32 %v268_v12, %v697_v6 }
  0x4b   :  { %v353_v33 = vadd.f32 %v352_v49, %v338_v11  ;;  %v286_v4 = vsel %vm872_vm10, %v283_v0, %v280_v61  ;;  %v298_v28 = vmul.f32 0.6931472, %v444_v25  ;;  %v301_v63 = vmul.f32 %v744_v47, %v300_v39 }
  0x4c   :  { %v318_v62 = vadd.f32 1.0, %v317_v22  ;;  %v448_v58 = vpop.eup %447  ;;  %vm893_vm12 = vcmp.lt.f32.partialorder %v302_v53, 0.0004427343  ;;  %v320_v36 = vand.u32 2147483647, %v762_v46  ;;  %v341_v37 = vadd.f32 %v277_v44, %v704_v8 }
  0x4d   :  { %v354_v41 = vadd.f32 %v353_v33, %v339_v48  ;;  %v295_v6 = vsel %vm884_vm11, %v292_v43, %v289_v56  ;;  %v307_v5 = vmul.f32 0.6931472, %v446_v57  ;;  %v310_v7 = vmul.f32 %v758_v35, %v309_v38 }
  0x4e   :  { %v327_v18 = vadd.f32 1.0, %v326_v3  ;;  %v450_v47 = vpop.eup %449  ;;  %vm902_vm13 = vcmp.lt.f32.partialorder %v311_v59, 0.0004427343  ;;  %v329_v30 = vand.u32 2147483647, %v776_v14  ;;  %v342_v13 = vadd.f32 %v286_v4, %v709_v23 }
  0x4f   :  { %v355_v17 = vadd.f32 %v354_v41, %v340_v32  ;;  %v107_v8 = vmul.f32 %v75_v29, %v594_v31  ;;  %v304_v27 = vsel %vm893_vm12, %v301_v63, %v298_v28  ;;  %v316_v50 = vmul.f32 0.6931472, %v448_v58 }
  0x50   :  { %v319_v2 = vmul.f32 %v762_v46, %v318_v62  ;;  %v959_v35 = vmax.f32 %v585_v20, 0.0  ;;  %vm321_vm14 = vcmp.lt.f32.partialorder %v320_v36, 0.0004427343  ;;  %v343_v9 = vadd.f32 %v295_v6, %v716_v24 }
  0x51   :  { %v356_v55 = vadd.f32 %v355_v17, %v341_v37  ;;  %v313_v23 = vsel %vm902_vm13, %v310_v7, %v307_v5  ;;  %v325_v51 = vmul.f32 0.6931472, %v450_v47  ;;  %v328_v10 = vmul.f32 %v776_v14, %v327_v18 }
  0x52   :  { %v121_v54 = vsub.f32 %v959_v35, %v651_v1  ;;  %v960_v12 = vmax.f32 %v587_v21, 0.0  ;;  %vm330_vm15 = vcmp.lt.f32.partialorder %v329_v30, 0.0004427343  ;;  %v344_v46 = vadd.f32 %v304_v27, %v732_v40 }
  0x53   :  { %v357_v15 = vadd.f32 %v356_v55, %v342_v13  ;;  %v322_v20 = vsel %vm321_vm14, %v319_v2, %v316_v50  ;;  %v961_v1 = vmax.f32 %v594_v31, 0.0  ;;  %v331_v52 = vsel %vm330_vm15, %v328_v10, %v325_v51 }
  0x54   :  { %v122_v0 = vsub.f32 %v960_v12, %v659_v42  ;;  %v345_v24 = vadd.f32 %v313_v23, %v121_v54 }
  0x55   :  { %v123_v19 = vsub.f32 %v961_v1, %v107_v8  ;;  %v358_v45 = vadd.f32 %v357_v15, %v343_v9 }
  0x56   :  { %v346_v11 = vadd.f32 %v322_v20, %v122_v0 }
  0x57   :  { %v359_v26 = vadd.f32 %v358_v45, %v344_v46  ;;  %v347_v61 = vadd.f32 %v331_v52, %v123_v19 }
  0x59   :  { %v360_v39 = vadd.f32 %v359_v26, %v345_v24 }
  0x5b   :  { %v361_v21 = vadd.f32 %v360_v39, %v346_v11 }
  0x5d   :  { %v362_v42 = vadd.f32 %v361_v21, %v347_v61 }
  0x5f   :  { %363 = vst [vmem:[#allocation7] sm:$0xff] %v362_v42 }
  0x60   :  { %374 = dma.vmem_to_hbm [thread:$0]  %s370_s1, 128, %s372_s23, [#allocation4]  }
  0x61   :  { %527 = dma.done.wait [#allocation4], 128  }
  0x62   :  { %528 = vsyncadd [#allocation4], 4294967168 }
  0x63   :  { %379 = vsyncpa [#allocation3], 1 }
  0x64   :  { %380 = vsyncpa [#allocation6], 1 }
  0x65   :  { %381 = vsyncpa [#allocation4], 1 }

</bundles_post_ra>
